<compile_context>
chip_gen: v7x
topology: tpu7x:2x2x1
jax: 0.10.0
libtpu: 0.0.40
codegen_flags: <defaults>
</compile_context>

<pallas_src>
import functools

import jax
import jax.numpy as jnp
from jax.experimental import pallas as pl
from jax.experimental.pallas import tpu as pltpu


def attn_decoder_kernel(h_ref, y_ref,
                        wih_ref, bgate_ref, whh_ref,
                        wf1d_ref, wf1h_ref, bf1_ref,
                        wf2_ref, bf2_ref,
                        out_ref,
                        d_sc, s_sc,
                        *, n_steps, t_total):
    t = pl.program_id(1)                       # time step (inner, "arbitrary")

    # d, s initialised to zeros at the start of every batch tile (init_variable)
    @pl.when(t == 0)
    def _():
        d_sc[...] = jnp.zeros_like(d_sc)
        s_sc[...] = jnp.zeros_like(s_sc)

    def lstm_step():
        h_t = h_ref[0]                         # (bt, C) f32 — current time block
        # attention weights: softmax over a size-1 leading dim == 1, so
        # h1 == h_t exactly; the attn1/attn2/attn3 MLP is dead code and elided.
        h_bf = h_t.astype(jnp.bfloat16)        # matmul LHS only; rest stays f32
        y_t = y_ref[0]                         # (bt, 1) f32

        # LSTM cell, input_size = 1, per-gate weights in PyTorch order i, f, g, o.
        # Pre-activation: y_t * w_ih_g^T + (b_ih_g + b_hh_g) + h1 @ w_hh_g^T
        pre = [
            y_t * wih_ref[g] + bgate_ref[g]
            + jnp.dot(h_bf, whh_ref[g], preferred_element_type=jnp.float32)
            for g in range(4)
        ]
        i_g = jax.nn.sigmoid(pre[0])
        f_g = jax.nn.sigmoid(pre[1])
        g_g = jnp.tanh(pre[2])
        o_g = jax.nn.sigmoid(pre[3])

        c = f_g * s_sc[...] + i_g * g_g
        d_sc[...] = o_g * jnp.tanh(c)          # d = h_n
        s_sc[...] = c                          # s = c_n

    if n_steps == t_total:                     # static: loop covers every block
        lstm_step()
    else:                                      # static: time_step < T_h
        pl.when(t < n_steps)(lstm_step)

    # y_res = fc2(fc1(cat(d, h_[-1]))) — split concat into two matmuls.
    @pl.when(t == t_total - 1)
    def _():
        h_last = h_ref[0].astype(jnp.bfloat16)         # current block == h_[-1]
        d_bf = d_sc[...].astype(jnp.bfloat16)
        f1 = (jnp.dot(d_bf, wf1d_ref[...], preferred_element_type=jnp.float32)
              + jnp.dot(h_last, wf1h_ref[...], preferred_element_type=jnp.float32)
              + bf1_ref[...])
        out_ref[...] = (jnp.dot(f1.astype(jnp.bfloat16), wf2_ref[...],
                                preferred_element_type=jnp.float32)
                        + bf2_ref[...])


def attn_decoder_forward(params, h, y_seq, time_step):
    B, T_h, C = h.shape
    H = params["w_hh"].shape[1]
    assert C == H, "AttnDecoder requires code_hidden_size == hidden_size"

    # --- y_seq handling (mirrors the PyTorch batch guard) ---
    if y_seq.ndim == 3:
        assert y_seq.shape[-1] == 1, "y_seq trailing feature dim must be 1"
        y2d = y_seq[..., 0]
    else:
        y2d = y_seq
    if y2d.shape[0] != B:
        y2d = y2d[:B]
    y2d = y2d.astype(jnp.float32)                       # (B, T_y)
    if y2d.shape[1] < T_h:                              # pad unused tail steps
        y2d = jnp.pad(y2d, ((0, 0), (0, T_h - y2d.shape[1])))

    n_steps = min(time_step, T_h)
    t_total = T_h

    # --- time-major activations (mirrors h.transpose(0, 1)) ---
    h_tm = jnp.transpose(h, (1, 0, 2)).astype(jnp.float32)   # (T_h, B, C)
    y_tm = y2d.T[:, :, None]                                  # (T_h, B, 1)

    wdt = jnp.bfloat16

    # --- per-gate LSTM weights (i, f, g, o), transposed for x @ W, bf16 MXU ---
    w_hh, w_ih = params["w_hh"], params["w_ih"]
    whh_t = jnp.stack([w_hh[g * H:(g + 1) * H].T for g in range(4)]).astype(wdt)   # (4,H,H)
    wih_r = jnp.stack([w_ih[g * H:(g + 1) * H, 0][None, :] for g in range(4)])     # (4,1,H) f32
    b_gates = jnp.stack([(params["b_ih"][g * H:(g + 1) * H]
                          + params["b_hh"][g * H:(g + 1) * H])[None, :]
                         for g in range(4)])                                        # (4,1,H) f32

    # --- fc1 split on the cat(d, h_last) boundary; bf16 weights ---
    wf1 = params["w_fc1"]                       # (H, H + C); cols [:H] act on d
    wf1d_t = wf1[:, :H].T.astype(wdt)           # (H, H)
    wf1h_t = wf1[:, H:].T.astype(wdt)           # (C, H)
    bf1 = params["b_fc1"][None, :]              # (1, H)
    wf2_t = params["w_fc2"].T.astype(wdt)       # (H, 1)
    bf2 = params["b_fc2"][None, :]              # (1, 1)

    # --- grid: (parallel batch tiles, arbitrary time) ---
    bt = B if B <= 16 else 16                   # batch tile (full B when small)
    nb = pl.cdiv(B, bt)
    grid = (nb, t_total)

    def full_spec(x):
        return pl.BlockSpec(x.shape, lambda b, t, _nd=x.ndim: (0,) * _nd)

    args = (h_tm, y_tm, wih_r, b_gates, whh_t,
            wf1d_t, wf1h_t, bf1, wf2_t, bf2)

    in_specs = [
        pl.BlockSpec((1, bt, C), lambda b, t: (t, b, 0)),   # h_t block (streamed)
        pl.BlockSpec((1, bt, 1), lambda b, t: (t, b, 0)),   # y_t block (streamed)
        full_spec(wih_r), full_spec(b_gates), full_spec(whh_t),
        full_spec(wf1d_t), full_spec(wf1h_t), full_spec(bf1),
        full_spec(wf2_t), full_spec(bf2),
    ]

    return pl.pallas_call(
        functools.partial(attn_decoder_kernel, n_steps=n_steps, t_total=t_total),
        out_shape=jax.ShapeDtypeStruct((B, 1), jnp.float32),
        grid=grid,
        in_specs=in_specs,
        out_specs=pl.BlockSpec((bt, 1), lambda b, t: (b, 0)),
        scratch_shapes=[pltpu.VMEM((bt, H), jnp.float32),    # d (decoder hidden)
                        pltpu.VMEM((bt, H), jnp.float32)],   # s (cell state)
        compiler_params=pltpu.CompilerParams(
            dimension_semantics=("parallel", "arbitrary"),
            # explicit headroom: double-buffered (1,bt,C) h blocks + resident
            # weights; safe on v5e/v6e/v7x scoped VMEM.
            vmem_limit_bytes=32 * 1024 * 1024,
        ),
    )(*args)


def reference_forward(params, h, y_seq, time_step):
    """Pure-JAX f32 reference mirroring the PyTorch forward literally
    (including the softmax over the size-1 leading dim)."""
    B, T_h, C = h.shape
    H = params["w_hh"].shape[1]
    y2d = y_seq.reshape(y_seq.shape[0], -1)
    if y2d.shape[0] != B:
        y2d = y2d[:B]
    d = jnp.zeros((B, H), jnp.float32)
    s = jnp.zeros((B, H), jnp.float32)
    for t in range(min(time_step, T_h)):
        h_t = h[:, t, :]
        x = jnp.concatenate([d, h_t], axis=1)
        a1 = x @ params["w_attn1"].T + params["b_attn1"]
        a2 = a1 @ params["w_attn2"].T + params["b_attn2"]
        aw = jnp.tanh(a2) @ params["w_attn3"].T + params["b_attn3"]      # (B, 1)
        attn = jax.nn.softmax(aw[None, :, :], axis=0)[0]                 # == ones
        h1 = attn * h_t
        y_t = y2d[:, t][:, None]
        gates = (y_t @ params["w_ih"].T + params["b_ih"]
                 + h1 @ params["w_hh"].T + params["b_hh"])
        i = jax.nn.sigmoid(gates[:, :H])
        f = jax.nn.sigmoid(gates[:, H:2 * H])
        g = jnp.tanh(gates[:, 2 * H:3 * H])
        o = jax.nn.sigmoid(gates[:, 3 * H:])
        c = f * s + i * g
        d = o * jnp.tanh(c)
        s = c
    z = jnp.concatenate([d, h[:, -1, :]], axis=1)
    f1 = z @ params["w_fc1"].T + params["b_fc1"]
    return f1 @ params["w_fc2"].T + params["b_fc2"]


def init_params(key, code_hidden_size, hidden_size):
    """Deterministic PyTorch-style uniform(-1/sqrt(fan_in)) init."""
    C, H = code_hidden_size, hidden_size
    keys = jax.random.split(key, 16)

    def u(k, shape, fan_in):
        bound = 1.0 / jnp.sqrt(jnp.float32(fan_in))
        return jax.random.uniform(k, shape, jnp.float32, -bound, bound)

    return {
        # attention MLP params exist in the module but are mathematically dead
        # in forward (softmax over size-1 dim); used only by the reference.
        "w_attn1": u(keys[0], (C, 2 * H), 2 * H), "b_attn1": u(keys[1], (C,), 2 * H),
        "w_attn2": u(keys[2], (C, C), C),         "b_attn2": u(keys[3], (C,), C),
        "w_attn3": u(keys[4], (1, C), C),         "b_attn3": u(keys[5], (1,), C),
        "w_ih":    u(keys[6], (4 * H, 1), H),     "b_ih":    u(keys[7], (4 * H,), H),
        "w_hh":    u(keys[8], (4 * H, H), H),     "b_hh":    u(keys[9], (4 * H,), H),
        "w_fc1":   u(keys[10], (H, C + H), C + H), "b_fc1":  u(keys[11], (H,), C + H),
        "w_fc2":   u(keys[12], (1, H), H),         "b_fc2":  u(keys[13], (1,), H),
    }


if __name__ == "__main__":
    # small shapes: code_hidden_size == hidden_size == 32 (required by the
    # module), batch = 2, time_step = 8
    B, H, C, T = 2, 32, 32, 8
    key = jax.random.PRNGKey(0)
    k_p, k_h, k_y = jax.random.split(key, 3)

    params = init_params(k_p, C, H)
    h = jax.random.normal(k_h, (B, T, C), jnp.float32)       # encoder hiddens (B, T, C)
    y_seq = jax.random.normal(k_y, (B, T, 1), jnp.float32)   # scalar input sequence

    out = attn_decoder_forward(params, h, y_seq, time_step=T)
    out = jax.block_until_ready(out)

    ref = reference_forward(params, h, y_seq, time_step=T)
    assert out.shape == (B, 1), out.shape
    # tolerance accounts for bf16 MXU weights (f32 accumulation) in the kernel
    # vs. the all-f32 reference.
    assert jnp.allclose(out, ref, rtol=2e-2, atol=2e-2), (out, ref)

    print("KERNEL_OK")
</pallas_src>

<mosaic_0001>
module attributes {stable_mosaic.version = 11 : i64} {
  func.func @attn_decoder_kernel(%arg0: i32, %arg1: i32, %arg2: memref<1x2x32xf32, #tpu.memory_space<vmem>>, %arg3: memref<1x2x1xf32, #tpu.memory_space<vmem>>, %arg4: memref<4x1x32xf32, #tpu.memory_space<vmem>>, %arg5: memref<4x1x32xf32, #tpu.memory_space<vmem>>, %arg6: memref<4x32x32xbf16, #tpu.memory_space<vmem>>, %arg7: memref<32x32xbf16, #tpu.memory_space<vmem>>, %arg8: memref<32x32xbf16, #tpu.memory_space<vmem>>, %arg9: memref<1x32xf32, #tpu.memory_space<vmem>>, %arg10: memref<32x1xbf16, #tpu.memory_space<vmem>>, %arg11: memref<1x1xf32, #tpu.memory_space<vmem>>, %arg12: memref<2x1xf32, #tpu.memory_space<vmem>>, %arg13: memref<2x32xf32, #tpu.memory_space<vmem>>, %arg14: memref<2x32xf32, #tpu.memory_space<vmem>>) attributes {dimension_semantics = [#tpu.dimension_semantics<parallel>, #tpu.dimension_semantics<arbitrary>], iteration_bounds = array<i64: 1, 8>, scalar_prefetch = 0 : i64, scratch_operands = 2 : i64, tpu.core_type = #tpu.core_type<tc>, window_params = [{transform_indices = @transform_0, window_bounds = array<i64: 1, 2, 32>}, {transform_indices = @transform_1, window_bounds = array<i64: 1, 2, 1>}, {pipeline_mode = #tpu.pipeline_mode<synchronous>, transform_indices = @transform_2, window_bounds = array<i64: 4, 1, 32>}, {pipeline_mode = #tpu.pipeline_mode<synchronous>, transform_indices = @transform_3, window_bounds = array<i64: 4, 1, 32>}, {pipeline_mode = #tpu.pipeline_mode<synchronous>, transform_indices = @transform_4, window_bounds = array<i64: 4, 32, 32>}, {pipeline_mode = #tpu.pipeline_mode<synchronous>, transform_indices = @transform_5, window_bounds = array<i64: 32, 32>}, {pipeline_mode = #tpu.pipeline_mode<synchronous>, transform_indices = @transform_6, window_bounds = array<i64: 32, 32>}, {pipeline_mode = #tpu.pipeline_mode<synchronous>, transform_indices = @transform_7, window_bounds = array<i64: 1, 32>}, {pipeline_mode = #tpu.pipeline_mode<synchronous>, transform_indices = @transform_8, window_bounds = array<i64: 32, 1>}, {pipeline_mode = #tpu.pipeline_mode<synchronous>, transform_indices = @transform_9, window_bounds = array<i64: 1, 1>}, {transform_indices = @transform_10, window_bounds = array<i64: 2, 1>}]} {
    %c0_i32 = arith.constant 0 : i32
    %0 = arith.cmpi eq, %arg1, %c0_i32 : i32
    %1 = arith.extui %0 : i1 to i32
    %c0_i32_0 = arith.constant 0 : i32
    %2 = arith.cmpi ne, %1, %c0_i32_0 : i32
    scf.if %2 {
      %cst_52 = arith.constant 0.000000e+00 : f32
      %87 = vector.broadcast %cst_52 : f32 to vector<2x32xf32>
      %c0_53 = arith.constant 0 : index
      %c0_54 = arith.constant 0 : index
      %88 = vector.load %arg13[%c0_53, %c0_54] : memref<2x32xf32, #tpu.memory_space<vmem>>, vector<2x32xf32>
      tpu.vector_store %arg13[%c0_53, %c0_54], %87 {strides = array<i32>} : memref<2x32xf32, #tpu.memory_space<vmem>>, vector<2x32xf32>,
      %cst_55 = arith.constant 0.000000e+00 : f32
      %89 = vector.broadcast %cst_55 : f32 to vector<2x32xf32>
      %c0_56 = arith.constant 0 : index
      %c0_57 = arith.constant 0 : index
      %90 = vector.load %arg14[%c0_56, %c0_57] : memref<2x32xf32, #tpu.memory_space<vmem>>, vector<2x32xf32>
      tpu.vector_store %arg14[%c0_56, %c0_57], %89 {strides = array<i32>} : memref<2x32xf32, #tpu.memory_space<vmem>>, vector<2x32xf32>,
    } else {
    }
    %c0 = arith.constant 0 : index
    %c0_1 = arith.constant 0 : index
    %c0_2 = arith.constant 0 : index
    %3 = vector.load %arg2[%c0, %c0_1, %c0_2] : memref<1x2x32xf32, #tpu.memory_space<vmem>>, vector<1x2x32xf32>
    %4 = vector.shape_cast %3 : vector<1x2x32xf32> to vector<2x32xf32>
    %5 = arith.truncf %4 : vector<2x32xf32> to vector<2x32xbf16>
    %c0_3 = arith.constant 0 : index
    %c0_4 = arith.constant 0 : index
    %c0_5 = arith.constant 0 : index
    %6 = vector.load %arg3[%c0_3, %c0_4, %c0_5] : memref<1x2x1xf32, #tpu.memory_space<vmem>>, vector<1x2x1xf32>
    %7 = vector.shape_cast %6 : vector<1x2x1xf32> to vector<2x1xf32>
    %c0_6 = arith.constant 0 : index
    %c0_7 = arith.constant 0 : index
    %c0_8 = arith.constant 0 : index
    %8 = vector.load %arg4[%c0_6, %c0_7, %c0_8] : memref<4x1x32xf32, #tpu.memory_space<vmem>>, vector<1x1x32xf32>
    %9 = vector.shape_cast %8 : vector<1x1x32xf32> to vector<1x32xf32>
    %10 = vector.broadcast %7 : vector<2x1xf32> to vector<2x32xf32>
    %11 = vector.broadcast %9 : vector<1x32xf32> to vector<2x32xf32>
    %12 = arith.mulf %10, %11 : vector<2x32xf32>
    %c0_9 = arith.constant 0 : index
    %c0_10 = arith.constant 0 : index
    %c0_11 = arith.constant 0 : index
    %13 = vector.load %arg5[%c0_9, %c0_10, %c0_11] : memref<4x1x32xf32, #tpu.memory_space<vmem>>, vector<1x1x32xf32>
    %14 = vector.shape_cast %13 : vector<1x1x32xf32> to vector<1x32xf32>
    %15 = vector.broadcast %14 : vector<1x32xf32> to vector<2x32xf32>
    %16 = arith.addf %12, %15 : vector<2x32xf32>
    %c0_12 = arith.constant 0 : index
    %c0_13 = arith.constant 0 : index
    %c0_14 = arith.constant 0 : index
    %17 = vector.load %arg6[%c0_12, %c0_13, %c0_14] : memref<4x32x32xbf16, #tpu.memory_space<vmem>>, vector<1x32x32xbf16>
    %18 = vector.shape_cast %17 : vector<1x32x32xbf16> to vector<32x32xbf16>
    %cst = arith.constant dense<0.000000e+00> : vector<2x32xf32>
    %19 = tpu.matmul %5, %18, %cst {dimension_numbers = #tpu.dot_dimension_numbers<[1], [0], [0], [1], [0, 0, 1, 1], [], []>} : vector<2x32xbf16>, vector<32x32xbf16>, vector<2x32xf32> -> vector<2x32xf32>
    %20 = arith.addf %16, %19 : vector<2x32xf32>
    %c1 = arith.constant 1 : index
    %c0_15 = arith.constant 0 : index
    %c0_16 = arith.constant 0 : index
    %21 = vector.load %arg4[%c1, %c0_15, %c0_16] : memref<4x1x32xf32, #tpu.memory_space<vmem>>, vector<1x1x32xf32>
    %22 = vector.shape_cast %21 : vector<1x1x32xf32> to vector<1x32xf32>
    %23 = vector.broadcast %7 : vector<2x1xf32> to vector<2x32xf32>
    %24 = vector.broadcast %22 : vector<1x32xf32> to vector<2x32xf32>
    %25 = arith.mulf %23, %24 : vector<2x32xf32>
    %c1_17 = arith.constant 1 : index
    %c0_18 = arith.constant 0 : index
    %c0_19 = arith.constant 0 : index
    %26 = vector.load %arg5[%c1_17, %c0_18, %c0_19] : memref<4x1x32xf32, #tpu.memory_space<vmem>>, vector<1x1x32xf32>
    %27 = vector.shape_cast %26 : vector<1x1x32xf32> to vector<1x32xf32>
    %28 = vector.broadcast %27 : vector<1x32xf32> to vector<2x32xf32>
    %29 = arith.addf %25, %28 : vector<2x32xf32>
    %c1_20 = arith.constant 1 : index
    %c0_21 = arith.constant 0 : index
    %c0_22 = arith.constant 0 : index
    %30 = vector.load %arg6[%c1_20, %c0_21, %c0_22] : memref<4x32x32xbf16, #tpu.memory_space<vmem>>, vector<1x32x32xbf16>
    %31 = vector.shape_cast %30 : vector<1x32x32xbf16> to vector<32x32xbf16>
    %cst_23 = arith.constant dense<0.000000e+00> : vector<2x32xf32>
    %32 = tpu.matmul %5, %31, %cst_23 {dimension_numbers = #tpu.dot_dimension_numbers<[1], [0], [0], [1], [0, 0, 1, 1], [], []>} : vector<2x32xbf16>, vector<32x32xbf16>, vector<2x32xf32> -> vector<2x32xf32>
    %33 = arith.addf %29, %32 : vector<2x32xf32>
    %c2 = arith.constant 2 : index
    %c0_24 = arith.constant 0 : index
    %c0_25 = arith.constant 0 : index
    %34 = vector.load %arg4[%c2, %c0_24, %c0_25] : memref<4x1x32xf32, #tpu.memory_space<vmem>>, vector<1x1x32xf32>
    %35 = vector.shape_cast %34 : vector<1x1x32xf32> to vector<1x32xf32>
    %36 = vector.broadcast %7 : vector<2x1xf32> to vector<2x32xf32>
    %37 = vector.broadcast %35 : vector<1x32xf32> to vector<2x32xf32>
    %38 = arith.mulf %36, %37 : vector<2x32xf32>
    %c2_26 = arith.constant 2 : index
    %c0_27 = arith.constant 0 : index
    %c0_28 = arith.constant 0 : index
    %39 = vector.load %arg5[%c2_26, %c0_27, %c0_28] : memref<4x1x32xf32, #tpu.memory_space<vmem>>, vector<1x1x32xf32>
    %40 = vector.shape_cast %39 : vector<1x1x32xf32> to vector<1x32xf32>
    %41 = vector.broadcast %40 : vector<1x32xf32> to vector<2x32xf32>
    %42 = arith.addf %38, %41 : vector<2x32xf32>
    %c2_29 = arith.constant 2 : index
    %c0_30 = arith.constant 0 : index
    %c0_31 = arith.constant 0 : index
    %43 = vector.load %arg6[%c2_29, %c0_30, %c0_31] : memref<4x32x32xbf16, #tpu.memory_space<vmem>>, vector<1x32x32xbf16>
    %44 = vector.shape_cast %43 : vector<1x32x32xbf16> to vector<32x32xbf16>
    %cst_32 = arith.constant dense<0.000000e+00> : vector<2x32xf32>
    %45 = tpu.matmul %5, %44, %cst_32 {dimension_numbers = #tpu.dot_dimension_numbers<[1], [0], [0], [1], [0, 0, 1, 1], [], []>} : vector<2x32xbf16>, vector<32x32xbf16>, vector<2x32xf32> -> vector<2x32xf32>
    %46 = arith.addf %42, %45 : vector<2x32xf32>
    %c3 = arith.constant 3 : index
    %c0_33 = arith.constant 0 : index
    %c0_34 = arith.constant 0 : index
    %47 = vector.load %arg4[%c3, %c0_33, %c0_34] : memref<4x1x32xf32, #tpu.memory_space<vmem>>, vector<1x1x32xf32>
    %48 = vector.shape_cast %47 : vector<1x1x32xf32> to vector<1x32xf32>
    %49 = vector.broadcast %7 : vector<2x1xf32> to vector<2x32xf32>
    %50 = vector.broadcast %48 : vector<1x32xf32> to vector<2x32xf32>
    %51 = arith.mulf %49, %50 : vector<2x32xf32>
    %c3_35 = arith.constant 3 : index
    %c0_36 = arith.constant 0 : index
    %c0_37 = arith.constant 0 : index
    %52 = vector.load %arg5[%c3_35, %c0_36, %c0_37] : memref<4x1x32xf32, #tpu.memory_space<vmem>>, vector<1x1x32xf32>
    %53 = vector.shape_cast %52 : vector<1x1x32xf32> to vector<1x32xf32>
    %54 = vector.broadcast %53 : vector<1x32xf32> to vector<2x32xf32>
    %55 = arith.addf %51, %54 : vector<2x32xf32>
    %c3_38 = arith.constant 3 : index
    %c0_39 = arith.constant 0 : index
    %c0_40 = arith.constant 0 : index
    %56 = vector.load %arg6[%c3_38, %c0_39, %c0_40] : memref<4x32x32xbf16, #tpu.memory_space<vmem>>, vector<1x32x32xbf16>
    %57 = vector.shape_cast %56 : vector<1x32x32xbf16> to vector<32x32xbf16>
    %cst_41 = arith.constant dense<0.000000e+00> : vector<2x32xf32>
    %58 = tpu.matmul %5, %57, %cst_41 {dimension_numbers = #tpu.dot_dimension_numbers<[1], [0], [0], [1], [0, 0, 1, 1], [], []>} : vector<2x32xbf16>, vector<32x32xbf16>, vector<2x32xf32> -> vector<2x32xf32>
    %59 = arith.addf %55, %58 : vector<2x32xf32>
    %60 = arith.negf %20 : vector<2x32xf32>
    %61 = math.exp %60 : vector<2x32xf32>
    %cst_42 = arith.constant 1.000000e+00 : f32
    %62 = vector.broadcast %cst_42 : f32 to vector<2x32xf32>
    %63 = arith.addf %62, %61 : vector<2x32xf32>
    %64 = arith.divf %62, %63 : vector<2x32xf32>
    %65 = arith.negf %33 : vector<2x32xf32>
    %66 = math.exp %65 : vector<2x32xf32>
    %cst_43 = arith.constant 1.000000e+00 : f32
    %67 = vector.broadcast %cst_43 : f32 to vector<2x32xf32>
    %68 = arith.addf %67, %66 : vector<2x32xf32>
    %69 = arith.divf %67, %68 : vector<2x32xf32>
    %70 = math.tanh %46 : vector<2x32xf32>
    %71 = arith.negf %59 : vector<2x32xf32>
    %72 = math.exp %71 : vector<2x32xf32>
    %cst_44 = arith.constant 1.000000e+00 : f32
    %73 = vector.broadcast %cst_44 : f32 to vector<2x32xf32>
    %74 = arith.addf %73, %72 : vector<2x32xf32>
    %75 = arith.divf %73, %74 : vector<2x32xf32>
    %c0_45 = arith.constant 0 : index
    %c0_46 = arith.constant 0 : index
    %76 = vector.load %arg14[%c0_45, %c0_46] : memref<2x32xf32, #tpu.memory_space<vmem>>, vector<2x32xf32>
    %77 = arith.mulf %69, %76 : vector<2x32xf32>
    %78 = arith.mulf %64, %70 : vector<2x32xf32>
    %79 = arith.addf %77, %78 : vector<2x32xf32>
    %80 = math.tanh %79 : vector<2x32xf32>
    %81 = arith.mulf %75, %80 : vector<2x32xf32>
    %c0_47 = arith.constant 0 : index
    %c0_48 = arith.constant 0 : index
    %82 = vector.load %arg13[%c0_47, %c0_48] : memref<2x32xf32, #tpu.memory_space<vmem>>, vector<2x32xf32>
    tpu.vector_store %arg13[%c0_47, %c0_48], %81 {strides = array<i32>} : memref<2x32xf32, #tpu.memory_space<vmem>>, vector<2x32xf32>,
    %c0_49 = arith.constant 0 : index
    %c0_50 = arith.constant 0 : index
    %83 = vector.load %arg14[%c0_49, %c0_50] : memref<2x32xf32, #tpu.memory_space<vmem>>, vector<2x32xf32>
    tpu.vector_store %arg14[%c0_49, %c0_50], %79 {strides = array<i32>} : memref<2x32xf32, #tpu.memory_space<vmem>>, vector<2x32xf32>,
    %c7_i32 = arith.constant 7 : i32
    %84 = arith.cmpi eq, %arg1, %c7_i32 : i32
    %85 = arith.extui %84 : i1 to i32
    %c0_i32_51 = arith.constant 0 : i32
    %86 = arith.cmpi ne, %85, %c0_i32_51 : i32
    scf.if %86 {
      %c0_52 = arith.constant 0 : index
      %c0_53 = arith.constant 0 : index
      %c0_54 = arith.constant 0 : index
      %87 = vector.load %arg2[%c0_52, %c0_53, %c0_54] : memref<1x2x32xf32, #tpu.memory_space<vmem>>, vector<1x2x32xf32>
      %88 = vector.shape_cast %87 : vector<1x2x32xf32> to vector<2x32xf32>
      %89 = arith.truncf %88 : vector<2x32xf32> to vector<2x32xbf16>
      %c0_55 = arith.constant 0 : index
      %c0_56 = arith.constant 0 : index
      %90 = vector.load %arg13[%c0_55, %c0_56] : memref<2x32xf32, #tpu.memory_space<vmem>>, vector<2x32xf32>
      %91 = arith.truncf %90 : vector<2x32xf32> to vector<2x32xbf16>
      %c0_57 = arith.constant 0 : index
      %c0_58 = arith.constant 0 : index
      %92 = vector.load %arg7[%c0_57, %c0_58] : memref<32x32xbf16, #tpu.memory_space<vmem>>, vector<32x32xbf16>
      %cst_59 = arith.constant dense<0.000000e+00> : vector<2x32xf32>
      %93 = tpu.matmul %91, %92, %cst_59 {dimension_numbers = #tpu.dot_dimension_numbers<[1], [0], [0], [1], [0, 0, 1, 1], [], []>} : vector<2x32xbf16>, vector<32x32xbf16>, vector<2x32xf32> -> vector<2x32xf32>
      %c0_60 = arith.constant 0 : index
      %c0_61 = arith.constant 0 : index
      %94 = vector.load %arg8[%c0_60, %c0_61] : memref<32x32xbf16, #tpu.memory_space<vmem>>, vector<32x32xbf16>
      %cst_62 = arith.constant dense<0.000000e+00> : vector<2x32xf32>
      %95 = tpu.matmul %89, %94, %cst_62 {dimension_numbers = #tpu.dot_dimension_numbers<[1], [0], [0], [1], [0, 0, 1, 1], [], []>} : vector<2x32xbf16>, vector<32x32xbf16>, vector<2x32xf32> -> vector<2x32xf32>
      %96 = arith.addf %93, %95 : vector<2x32xf32>
      %c0_63 = arith.constant 0 : index
      %c0_64 = arith.constant 0 : index
      %97 = vector.load %arg9[%c0_63, %c0_64] : memref<1x32xf32, #tpu.memory_space<vmem>>, vector<1x32xf32>
      %98 = vector.broadcast %97 : vector<1x32xf32> to vector<2x32xf32>
      %99 = arith.addf %96, %98 : vector<2x32xf32>
      %100 = arith.truncf %99 : vector<2x32xf32> to vector<2x32xbf16>
      %c0_65 = arith.constant 0 : index
      %c0_66 = arith.constant 0 : index
      %101 = vector.load %arg10[%c0_65, %c0_66] : memref<32x1xbf16, #tpu.memory_space<vmem>>, vector<32x1xbf16>
      %cst_67 = arith.constant dense<0.000000e+00> : vector<2x1xf32>
      %102 = tpu.matmul %100, %101, %cst_67 {dimension_numbers = #tpu.dot_dimension_numbers<[1], [0], [0], [1], [0, 0, 1, 1], [], []>} : vector<2x32xbf16>, vector<32x1xbf16>, vector<2x1xf32> -> vector<2x1xf32>
      %c0_68 = arith.constant 0 : index
      %c0_69 = arith.constant 0 : index
      %103 = vector.load %arg11[%c0_68, %c0_69] : memref<1x1xf32, #tpu.memory_space<vmem>>, vector<1x1xf32>
      %104 = vector.broadcast %103 : vector<1x1xf32> to vector<2x1xf32>
      %105 = arith.addf %102, %104 : vector<2x1xf32>
      %c0_70 = arith.constant 0 : index
      %c0_71 = arith.constant 0 : index
      %106 = vector.load %arg12[%c0_70, %c0_71] : memref<2x1xf32, #tpu.memory_space<vmem>>, vector<2x1xf32>
      tpu.vector_store %arg12[%c0_70, %c0_71], %105 {strides = array<i32>} : memref<2x1xf32, #tpu.memory_space<vmem>>, vector<2x1xf32>,
    } else {
    }
    return
  }
  func.func @transform_0(%arg0: i32, %arg1: i32) -> (i32, i32, i32) {
    %c0_i32 = arith.constant 0 : i32
    %c0_i32_0 = arith.constant 0 : i32
    return %arg1, %arg0, %c0_i32 : i32, i32, i32
  }
  func.func @transform_1(%arg0: i32, %arg1: i32) -> (i32, i32, i32) {
    %c0_i32 = arith.constant 0 : i32
    %c0_i32_0 = arith.constant 0 : i32
    return %arg1, %arg0, %c0_i32 : i32, i32, i32
  }
  func.func @transform_2(%arg0: i32, %arg1: i32) -> (i32, i32, i32) {
    %c0_i32 = arith.constant 0 : i32
    %c0_i32_0 = arith.constant 0 : i32
    %c0_i32_1 = arith.constant 0 : i32
    %c0_i32_2 = arith.constant 0 : i32
    return %c0_i32, %c0_i32_0, %c0_i32_1 : i32, i32, i32
  }
  func.func @transform_3(%arg0: i32, %arg1: i32) -> (i32, i32, i32) {
    %c0_i32 = arith.constant 0 : i32
    %c0_i32_0 = arith.constant 0 : i32
    %c0_i32_1 = arith.constant 0 : i32
    %c0_i32_2 = arith.constant 0 : i32
    return %c0_i32, %c0_i32_0, %c0_i32_1 : i32, i32, i32
  }
  func.func @transform_4(%arg0: i32, %arg1: i32) -> (i32, i32, i32) {
    %c0_i32 = arith.constant 0 : i32
    %c0_i32_0 = arith.constant 0 : i32
    %c0_i32_1 = arith.constant 0 : i32
    %c0_i32_2 = arith.constant 0 : i32
    return %c0_i32, %c0_i32_0, %c0_i32_1 : i32, i32, i32
  }
  func.func @transform_5(%arg0: i32, %arg1: i32) -> (i32, i32) {
    %c0_i32 = arith.constant 0 : i32
    %c0_i32_0 = arith.constant 0 : i32
    %c0_i32_1 = arith.constant 0 : i32
    return %c0_i32, %c0_i32_0 : i32, i32
  }
  func.func @transform_6(%arg0: i32, %arg1: i32) -> (i32, i32) {
    %c0_i32 = arith.constant 0 : i32
    %c0_i32_0 = arith.constant 0 : i32
    %c0_i32_1 = arith.constant 0 : i32
    return %c0_i32, %c0_i32_0 : i32, i32
  }
  func.func @transform_7(%arg0: i32, %arg1: i32) -> (i32, i32) {
    %c0_i32 = arith.constant 0 : i32
    %c0_i32_0 = arith.constant 0 : i32
    %c0_i32_1 = arith.constant 0 : i32
    return %c0_i32, %c0_i32_0 : i32, i32
  }
  func.func @transform_8(%arg0: i32, %arg1: i32) -> (i32, i32) {
    %c0_i32 = arith.constant 0 : i32
    %c0_i32_0 = arith.constant 0 : i32
    %c0_i32_1 = arith.constant 0 : i32
    return %c0_i32, %c0_i32_0 : i32, i32
  }
  func.func @transform_9(%arg0: i32, %arg1: i32) -> (i32, i32) {
    %c0_i32 = arith.constant 0 : i32
    %c0_i32_0 = arith.constant 0 : i32
    %c0_i32_1 = arith.constant 0 : i32
    return %c0_i32, %c0_i32_0 : i32, i32
  }
  func.func @transform_10(%arg0: i32, %arg1: i32) -> (i32, i32) {
    %c0_i32 = arith.constant 0 : i32
    %c0_i32_0 = arith.constant 0 : i32
    return %arg0, %c0_i32 : i32, i32
  }
}

</mosaic_0001>

<bundles_post_ra>
// kernel: tpu_custom_call.1
= control target key start
LH: loop header
LB: loop body
LE: loop exit
PB: predicated region body
PF: predicated region fallthrough
CT: control target
= control target key end

     0   :  { %s1707_s0 = inlined_call_operand.vmem [shape: f32[8,2,32], index: 0, kind: input, shape index: {}]   ;;  %s1708_s1 = inlined_call_operand.vmem [shape: f32[8,2,1], index: 1, kind: input, shape index: {}]   ;;  %s1709_s2 = inlined_call_operand.hbm [shape: f32[4,1,32], index: 2, kind: input, shape index: {}]   ;;  %s1710_s3 = inlined_call_operand.hbm [shape: f32[4,1,32], index: 3, kind: input, shape index: {}]   ;;  %s1711_s4 = inlined_call_operand.hbm [shape: bf16[4,32,32], index: 4, kind: input, shape index: {}]   ;;  %s1712_s5 = inlined_call_operand.vmem [shape: bf16[32,32], index: 5, kind: input, shape index: {}]   ;;  %s1713_s6 = inlined_call_operand.vmem [shape: bf16[32,32], index: 6, kind: input, shape index: {}]   ;;  %s1714_s7 = inlined_call_operand.vmem [shape: f32[1,32], index: 7, kind: input, shape index: {}]   ;;  %s1715_s8 = inlined_call_operand.vmem [shape: bf16[32,1], index: 8, kind: input, shape index: {}]   ;;  %s1716_s9 = inlined_call_operand.<no memory space> [shape: f32[1,1], index: 9, kind: input, shape index: {}]   ;;  %s1717_s10 = inlined_call_operand.vmem [shape: f32[2,1], index: 10, kind: output, shape index: {}]  }
   0x1   :  { %v15_v0 = vstv %s1716_s9 }
   0x2   :  { %16 = vst [vmem:[#allocation4] sm:$0x1] %v15_v0 }
   0x3   :  { %17 = vsyncpa [#allocation6], 0 }
   0x4   :  { %18 = vsyncpa [#allocation8], 0  ;;  %s1523_s15 = smov 0   ;;  %s1525_s16 = smov 0  }
   0x5   :  { %s1527_s17 = smov 0  }
   0x6 LB: > { %1722 = sst [smem:[#allocation12_spill]] %s1446_s16  ;;  %s1112_s9 = sadd.s32 4294967295, %s1450_s17   ;;  %s1450_s17 = sphi %s1527_s17, %s24_s17   ;;  %s1446_s16 = sphi %s1525_s16, %s1731_s16   ;;  %s1442_s15 = sphi %s1523_s15, %s1730_s15  }
   0x7   : > { %p1113_p0 = scmp.ge.s32.totalorder %s1450_s17, 1  ;;  %p291_p1 = scmp.lt.s32.totalorder %s1450_s17, 9 }
   0x8   : > { %p1541_p2 = scmp.eq.s32.totalorder %s1112_s9, 0  ;;  %s1452_s20 = smov [#allocation7]  }
   0x9   : > { %p1545_p3 = pnand %p1113_p0, %p291_p1  ;;  %s316_s21 = sshll.u32 %s1452_s20, 4  ;;  %s1549_s21 = int_to_ptr.vmem [resolvable:$true] %s316_s21 }
   0xa   : > { %s1723_s18 = scalar_select %p1541_p2, 1, 0 }
   0xb   : > { %s1724_s19 = scalar_select %p1545_p3, 1, 0 }
   0xc   : > { %p1252_p4 = pneg %p1545_p3  ;;  %s33_s23 = sadd.s32 1, %s1446_s16 }
   0xd   : > { %p1560_p6 = scmp.ge.s32.totalorder %s33_s23, 8  ;;  %s1453_s25 = smov [#allocation5]  }
   0xe   : > { %p1555_p5 = pnand %p1541_p2, %p1252_p4  ;;  %s303_s26 = sshll.u32 %s1453_s25, 4  ;;  %s304_s26 = int_to_ptr.vmem [resolvable:$true] %s303_s26 }
   0xf   : > { %s1336_s29 = scalar_lea.hbm %s1710_s3, 64 }
  0x10   : > { %p1337_p7 = scmp.ne.s32.totalorder %s1710_s3, %s1336_s29  ;;  %p1572_p8 = pneg %p1555_p5 }
  0x11   : > { %p1343_p11 = scmp.lt.u32.totalorder %s1336_s29, %s1710_s3 }
  0x12   : > { %p1339_p9 = pnand %p1572_p8, %p1337_p7 }
  0x14   : > { %p1340_p10 = pneg %p1339_p9 }
  0x16   : > { %p1345_p12 = pnand %p1343_p11, %p1340_p10 }
  0x18   : > { %1348 = shalt.err (!%p1345_p12)
}
  0x19   : > { %s1349_s9 = scalar_lea.vmem %s1549_s21, 64  ;;  %p1357_p4 = scmp.lt.s32.totalorder %s1549_s21, %s1549_s21 }
  0x1a   : > { %p1350_p13 = scmp.ne.s32.totalorder %s1549_s21, %s1349_s9  ;;  %p1358_p2 = scmp.lt.s32.totalorder %s1349_s9, %s1349_s9 }
  0x1c   : > { %p1352_p0 = pnand %p1350_p13, %p1572_p8  ;;  %p1359_p7 = por %p1358_p2, %p1357_p4 }
  0x1e   : > { %p1353_p1 = pneg %p1352_p0 }
  0x20   : > { %p1360_p9 = pnand %p1359_p7, %p1353_p1 }
  0x22   : > { %1363 = shalt.err (!%p1360_p9)
}
  0x23   : > { %s1454_s20 = smov 16   ;;  %s1455_s25 = smov 1  }
  0x24   : > { %1258 = dma.hbm_to_vmem [thread:$0]  (!%p1555_p5), %s1710_s3, 64, %s1549_s21, [#allocation8], %s1454_s20, %s1454_s20, %s1455_s25  }
  0x25   : > { %s1733_s23 = smov (%p1560_p6, %s33_s23), 0  ;;  %s1364_s11 = scalar_lea.hbm %s1709_s2, 64 }
  0x26   : > { %p1365_p2 = scmp.ne.s32.totalorder %s1709_s2, %s1364_s11  ;;  %p1371_p12 = scmp.lt.u32.totalorder %s1364_s11, %s1709_s2 }
  0x28   : > { %p1367_p10 = pnand %p1365_p2, %p1572_p8 }
  0x2a   : > { %p1368_p11 = pneg %p1367_p10 }
  0x2c   : > { %p1373_p13 = pnand %p1371_p12, %p1368_p11 }
  0x2e   : > { %1376 = shalt.err (!%p1373_p13)
}
  0x2f   : > { %s1377_s21 = scalar_lea.vmem %s304_s26, 64  ;;  %p1385_p4 = scmp.lt.s32.totalorder %s304_s26, %s304_s26 }
  0x30   : > { %p1378_p6 = scmp.ne.s32.totalorder %s304_s26, %s1377_s21  ;;  %p1386_p7 = scmp.lt.s32.totalorder %s1377_s21, %s1377_s21 }
  0x32   : > { %p1380_p0 = pnand %p1378_p6, %p1572_p8  ;;  %p1387_p9 = por %p1386_p7, %p1385_p4 }
  0x34   : > { %p1381_p1 = pneg %p1380_p0 }
  0x36   : > { %p1388_p3 = pnand %p1387_p9, %p1381_p1 }
  0x38   : > { %1391 = shalt.err (!%p1388_p3)
}
  0x39   : > { %1255 = dma.hbm_to_vmem [thread:$0]  (!%p1555_p5), %s1709_s2, 64, %s304_s26, [#allocation6], %s1454_s20, %s1454_s20, %s1455_s25  }
  0x3a   : > { %s1456_s16 = smov [#allocation9]   ;;  %s1392_s11 = scalar_lea.hbm %s1711_s4, 1024 }
  0x3b   : > { %s329_s28 = sshll.u32 %s1456_s16, 4  ;;  %p1393_p2 = scmp.ne.s32.totalorder %s1711_s4, %s1392_s11  ;;  %s330_s28 = int_to_ptr.vmem [resolvable:$true] %s329_s28 }
  0x3c   : > { %p1399_p11 = scmp.lt.u32.totalorder %s1392_s11, %s1711_s4 }
  0x3d   : > { %p1395_p3 = pnand %p1393_p2, %p1572_p8 }
  0x3f   : > { %p1396_p10 = pneg %p1395_p3 }
  0x41   : > { %p1401_p12 = pnand %p1399_p11, %p1396_p10 }
  0x43   : > { %1404 = shalt.err (!%p1401_p12)
}
  0x44   : > { %s1405_s26 = scalar_lea.vmem %s330_s28, 1024  ;;  %p1413_p1 = scmp.lt.s32.totalorder %s330_s28, %s330_s28 }
  0x45   : > { %p1406_p13 = scmp.ne.s32.totalorder %s330_s28, %s1405_s26  ;;  %p1414_p4 = scmp.lt.s32.totalorder %s1405_s26, %s1405_s26 }
  0x47   : > { %p1408_p6 = pnand %p1406_p13, %p1572_p8  ;;  %p1415_p7 = por %p1414_p4, %p1413_p1 }
  0x49   : > { %p1409_p0 = pneg %p1408_p6 }
  0x4b   : > { %p1416_p9 = pnand %p1415_p7, %p1409_p0 }
  0x4d   : > { %1419 = shalt.err (!%p1416_p9)
}
  0x4e   : > { %s1457_s20 = smov 64   ;;  %s1458_s25 = smov 4  }
  0x4f   : > { %1261 = dma.hbm_to_vmem [thread:$0]  (!%p1555_p5), %s1711_s4, 1024, %s330_s28, [#allocation8], %s1457_s20, %s1457_s20, %s1458_s25  }
  0x50   : > { %p1728_p2 = scmp.ne.s32.totalorder %s1724_s19, 0 }
  0x51   : > { %p1729_p3 = scmp.ne.s32.totalorder (!%p1728_p2), %s1723_s18, 0 }
  0x52   : > { %380 = sbr.rel (%p1728_p2) target bundleno = 812 (0x32c), region = 60 }
  0x59   : > { %1433 = dma.done.wait (%p1729_p3), [#allocation6], 64  }
  0x5a   : > { %1435 = vsyncadd (%p1729_p3), [#allocation6], 4294967232 }
  0x5b   : > { %1437 = dma.done.wait (%p1729_p3), [#allocation8], 1088  }
  0x5c   : > { %1439 = vsyncadd (%p1729_p3), [#allocation8], 4294966208  ;;  %p434_p8 = scmp.lt.s32.totalorder %s1442_s15, 7  ;;  %p1124_p5 = scmp.ne.s32.totalorder %s1442_s15, 0 }
  0x5d   : > { %vm457_vm0 = vcmask (!%p1124_p5), 254976   ;;  %v1459_v1 = vmov (!%p1124_p5), 0.0  }
  0x5e   : > { %s435_s22 = scalar_select %p434_p8, %s1442_s15, 7 }
  0x5f   : > { %456 = sbr.rel (%p1124_p5) target bundleno = 102 (0x66), region = 76  ;;  %458 = vst.msk [vmem:[#allocation2] sm:$0x3] (!%p1124_p5), %vm457_vm0, %v1459_v1  ;;  %459 = vst.msk [vmem:[#allocation3] sm:$0x3] (!%p1124_p5), %vm457_vm0, %v1459_v1 }
  0x60   : > { %s1122_s12 = sshll.u32 %s435_s22, 1 }
  0x61   : > { %s1648_s28 = scalar_lea.vmem %s1707_s0, %s1122_s12  ;;  %s1653_s11 = scalar_lea.vmem %s1708_s1, %s1122_s12 }
  0x66 PF: > { %v1306_v2 = vld [vmem:[#allocation9] sm:$0xff]   ;;  %v1460_v3 = vmov 0.0   ;;  %v1307_v4 = vld [vmem:[#allocation9 + $0x10] sm:$0xff]   ;;  %v1308_v5 = vld [vmem:[#allocation9 + $0x8] sm:$0xff]   ;;  %vm1461_vm1 = vmmov 0   ;;  %v1462_v9 = vmov 0  }
  0x67   : > { %1184 = vmatprep.subr.bf16.mxu0 %v1460_v3  ;;  %1192 = vmatprep.subr.bf16.mxu1 %v1460_v3  ;;  %v1309_v6 = vld [vmem:[#allocation9 + $0x18] sm:$0xff]   ;;  %v460_v7 = vld [vmem:[%s1648_s28] sm:$0x3]  ;;  %vm500_vm2 = vcmask 261120   ;;  %v1310_v10 = vld [vmem:[#allocation9 + $0x20] sm:$0xff]   ;;  %vm798_vm3 = vcmask 254976  }
  0x68   : > { %1185 = vmatpush3.bf16.msra.mxu0 %v1306_v2  ;;  %1188 = vmatprep.mubr.msk.bf16.mxu0 %vm1461_vm1, %v1460_v3  ;;  %v461_v8 = vpack.c.bf16 %v460_v7, %v460_v7  ;;  %v1311_v11 = vld [vmem:[#allocation9 + $0x30] sm:$0xff]   ;;  %v1312_v13 = vld [vmem:[#allocation9 + $0x28] sm:$0xff]   ;;  %v1313_v14 = vld [vmem:[#allocation9 + $0x38] sm:$0xff]   ;;  %p1148_p10 = scmp.ne.s32.totalorder %s1442_s15, 7 }
  0x69   : > { %1193 = vmatpush3.bf16.msra.mxu1 %v1307_v4  ;;  %1186 = vmatprep.subr.bf16.mxu0 %v1460_v3  ;;  %v462_v12 = vld [vmem:[%s1653_s11] sm:$0x3]  ;;  %v1125_v15 = vld [vmem:[#allocation5] ss:$0 sm:$0xff]  ;;  %v1130_v17 = vld [vmem:[#allocation5 + $0x1] ss:$0 sm:$0xff] }
  0x6a   : > { %1194 = vmatprep.subr.bf16.mxu1 %v1460_v3  ;;  %1196 = vmatprep.mubr.msk.bf16.mxu1 %vm1461_vm1, %v1460_v3  ;;  %v1126_v20 = vld [vmem:[#allocation7] ss:$0 sm:$0xff]  ;;  %v1131_v21 = vld [vmem:[#allocation7 + $0x1] ss:$0 sm:$0xff]  ;;  %v1140_v25 = vld [vmem:[#allocation5 + $0x3] ss:$0 sm:$0xff] }
  0x6b   : > { %1305 = vset.pattern.permute.xlu0 %v1462_v9  ;;  %v1135_v35 = vld [vmem:[#allocation5 + $0x2] ss:$0 sm:$0xff]  ;;  %v1141_v39 = vld [vmem:[#allocation7 + $0x3] ss:$0 sm:$0xff]  ;;  %v1136_v41 = vld [vmem:[#allocation7 + $0x2] ss:$0 sm:$0xff] }
  0x6c   : > { %1187 = vmatpush3.bf16.msra.mxu0 %v1308_v5  ;;  %466 = vperm.xlu0 %1305, %v462_v12   ;;  %v792_v61 = vld [vmem:[#allocation3] sm:$0x3]  ;;  %vm1464_vm4 = vmmov (!%p1148_p10), 0   ;;  %v805_v12 = vld [vmem:[%s1648_s28] sm:$0x3] (!%p1148_p10)  ;;  %vm1002_vm5 = vcmask (!%p1148_p10), 1024  }
  0x6d   : > { %1195 = vmatpush3.bf16.msra.mxu1 %v1309_v6  ;;  %1200 = vmatprep.subr.bf16.mxu0 %v1460_v3  ;;  %v1330_v7 = vld [vmem:[%s1713_s6] sm:$0xff] (!%p1148_p10)  }
  0x6e   : > { %1208 = vmatprep.subr.bf16.mxu1 %v1460_v3  ;;  %v1331_v9 = vld [vmem:[%s1712_s5] sm:$0xff] (!%p1148_p10)  }
  0x6f   : > { %1189 = vmatmul.mubr.msk.bf16.vlgmr.msra.gmra.mrb[0].mxu0 %vm500_vm2, %v461_v8 }
  0x70   : > { %1197 = vmatmul.mubr.msk.bf16.vlgmr.msra.gmra.mrb[0].mxu1 %vm500_vm2, %v461_v8  ;;  %1201 = vmatpush3.bf16.msra.mxu0 %v1310_v10  ;;  %v1332_v10 = vld [vmem:[%s1713_s6 + $0x8] sm:$0xff] (!%p1148_p10)  }
  0x71   : > { %1209 = vmatpush3.bf16.msra.mxu1 %v1311_v11  ;;  %1202 = vmatprep.subr.bf16.mxu0 %v1460_v3  ;;  %v1333_v11 = vld [vmem:[%s1712_s5 + $0x8] sm:$0xff] (!%p1148_p10)  }
  0x72   : > { %1210 = vmatprep.subr.bf16.mxu1 %v1460_v3  ;;  %1204 = vmatprep.mubr.msk.bf16.mxu0 %vm1461_vm1, %v1460_v3 }
  0x73   : > { %1212 = vmatprep.mubr.msk.bf16.mxu1 %vm1461_vm1, %v1460_v3 }
  0x74   : > { %1203 = vmatpush3.bf16.msra.mxu0 %v1312_v13 }
  0x75   : > { %1211 = vmatpush3.bf16.msra.mxu1 %v1313_v14  ;;  %v806_v14 = vpack.c.bf16 (!%p1148_p10), %v805_v12, %v805_v12 }
  0x77   : > { %1205 = vmatmul.mubr.msk.bf16.vlgmr.msra.gmra.mrb[4].mxu0 %vm500_vm2, %v461_v8 }
  0x78   : > { %1213 = vmatmul.mubr.msk.bf16.vlgmr.msra.gmra.mrb[4].mxu1 %vm500_vm2, %v461_v8  ;;  %v1463_v8 = vmov (!%p1148_p10), 0.0  }
  0x79   : > { %1216 = vmatprep.subr.bf16.mxu0 (!%p1148_p10), %v1463_v8  ;;  %1224 = vmatprep.subr.bf16.mxu1 (!%p1148_p10), %v1463_v8 }
  0x7a   : > { %1217 = vmatpush3.bf16.msra.mxu0 (!%p1148_p10), %v1330_v7  ;;  %1220 = vmatprep.mubr.msk.bf16.mxu0 (!%p1148_p10), %vm1464_vm4, %v1463_v8 }
  0x7b   : > { %1225 = vmatpush3.bf16.msra.mxu1 (!%p1148_p10), %v1331_v9  ;;  %1218 = vmatprep.subr.bf16.mxu0 (!%p1148_p10), %v1463_v8 }
  0x7c   : > { %1226 = vmatprep.subr.bf16.mxu1 (!%p1148_p10), %v1463_v8  ;;  %1228 = vmatprep.mubr.msk.bf16.mxu1 (!%p1148_p10), %vm1464_vm4, %v1463_v8 }
  0x7e   : > { %1219 = vmatpush3.bf16.msra.mxu0 (!%p1148_p10), %v1332_v10 }
  0x7f   : > { %1227 = vmatpush3.bf16.msra.mxu1 (!%p1148_p10), %v1333_v11  ;;  %1232 = vmatprep.subr.bf16.mxu0 (!%p1148_p10), %v1463_v8 }
  0xeb   : > { %v467_v16 = vpop.permute.xlu0 %466 }
  0xec   : > { %v475_v18 = vmul.f32 %v1125_v15, %v467_v16  ;;  %v553_v19 = vmul.f32 %v1130_v17, %v467_v16  ;;  %v705_v36 = vmul.f32 %v1140_v25, %v467_v16  ;;  %v629_v40 = vmul.f32 %v1135_v35, %v467_v16  ;;  %v1334_v16 = vld [vmem:[%s1715_s8] sm:$0xff] (!%p1148_p10)   ;;  %v1335_v17 = vld [vmem:[%s1715_s8 + $0x8] sm:$0xff] (!%p1148_p10)  }
  0xee   : > { %v483_v22 = vadd.f32 %v1126_v20, %v475_v18  ;;  %v562_v23 = vadd.f32 %v1131_v21, %v553_v19  ;;  %v714_v43 = vadd.f32 %v1141_v39, %v705_v36  ;;  %v638_v49 = vadd.f32 %v1136_v41, %v629_v40  ;;  %v1155_v20 = vld [vmem:[%s1714_s7] ss:$0 sm:$0xff] (!%p1148_p10) }
 0x142   : > { %v538_v24 = vpop.f32.mrb[0].mxu0 }
 0x143   : > { %v544_v26 = vadd.f32 %v538_v24, %v483_v22  ;;  %v614_v27 = vpop.f32.mrb[0].mxu1  ;;  %v1190_v28 = vpop.f32.mrb[1].mxu0 }
 0x144   : > { %v620_v29 = vadd.f32 %v614_v27, %v562_v23  ;;  %v1198_v30 = vpop.f32.mrb[1].mxu1  ;;  %v541_v31 = vpop.f32.mrb[2].mxu0 }
 0x145   : > { %v1145_v32 = vmul.f32 -1.442695, %v544_v26  ;;  %v617_v33 = vpop.f32.mrb[2].mxu1  ;;  %v1191_v34 = vpop.f32.mrb[3].mxu0  ;;  %1221 = vmatmul.mubr.msk.bf16.vlgmr.msra.gmra.mrb[0].mxu0 (!%p1148_p10), %vm500_vm2, %v806_v14  ;;  %v1156_v30 = vld [vmem:[#allocation4] ss:$0 sm:$0xff] (!%p1148_p10) }
 0x146   : > { %v1146_v37 = vmul.f32 -1.442695, %v620_v29  ;;  %v1199_v38 = vpop.f32.mrb[3].mxu1  ;;  %1233 = vmatpush3.bf16.msra.mxu0 (!%p1148_p10), %v1334_v16  ;;  %1236 = vmatprep.mubr.msk.bf16.mxu0 (!%p1148_p10), %vm1464_vm4, %v1463_v8 }
 0x147   : > { %1314 = vpow2.f32 %v1145_v32  ;;  %1234 = vmatprep.subr.bf16.mxu0 (!%p1148_p10), %v1463_v8 }
 0x148   : > { %1316 = vpow2.f32 %v1146_v37 }
 0x14a   : > { %v690_v42 = vpop.f32.mrb[4].mxu0  ;;  %1235 = vmatpush3.bf16.msra.mxu0 (!%p1148_p10), %v1335_v17 }
 0x14b   : > { %v766_v44 = vpop.f32.mrb[4].mxu1  ;;  %v1206_v45 = vpop.f32.mrb[5].mxu0  ;;  %v696_v54 = vadd.f32 %v690_v42, %v638_v49 }
 0x14c   : > { %v772_v46 = vadd.f32 %v766_v44, %v714_v43  ;;  %v1214_v47 = vpop.f32.mrb[5].mxu1  ;;  %v693_v48 = vpop.f32.mrb[6].mxu0 }
 0x14d   : > { %v769_v50 = vpop.f32.mrb[6].mxu1  ;;  %v1207_v51 = vpop.f32.mrb[7].mxu0 }
 0x14e   : > { %v1147_v52 = vmul.f32 -1.442695, %v772_v46  ;;  %v1215_v53 = vpop.f32.mrb[7].mxu1 }
 0x150   : > { %1318 = vpow2.f32 %v1147_v52 }
 0x151   : > { %v1315_v55 = vpop.eup %1314  ;;  %1320 = vtanh.f32 %v696_v54 }
 0x152   : > { %v1317_v56 = vpop.eup %1316  ;;  %v776_v57 = vadd.f32 1.0, %v1315_v55 }
 0x153   : > { %v782_v58 = vadd.f32 1.0, %v1317_v56 }
 0x154   : > { %1322 = vrcp.f32 %v776_v57 }
 0x155   : > { %1324 = vrcp.f32 %v782_v58 }
 0x15a   : > { %v1319_v59 = vpop.eup %1318 }
 0x15b   : > { %v1321_v60 = vpop.eup %1320  ;;  %v789_v1 = vadd.f32 1.0, %v1319_v59 }
 0x15d   : > { %1326 = vrcp.f32 %v789_v1 }
 0x15e   : > { %v1323_v62 = vpop.eup %1322 }
 0x15f   : > { %v1325_v63 = vpop.eup %1324  ;;  %v794_v0 = vmul.f32 %v1323_v62, %v1321_v60 }
 0x160   : > { %v793_v2 = vmul.f32 %v1325_v63, %v792_v61 }
 0x162   : > { %v795_v3 = vadd.f32 %v794_v0, %v793_v2 }
 0x164   : > { %1328 = vtanh.f32 %v795_v3  ;;  %800 = vst.msk [vmem:[#allocation3] sm:$0x3] %vm798_vm3, %v795_v3 }
 0x167   : > { %v1327_v4 = vpop.eup %1326 }
 0x16b   : > { %804 = sbr.rel (%p1148_p10) target bundleno = 812 (0x32c), region = 80 }
 0x16e   : > { %v1329_v5 = vpop.eup %1328 }
 0x16f   : > { %v797_v6 = vmul.f32 %v1329_v5, %v1327_v4 }
 0x171   : > { %799 = vst.msk [vmem:[#allocation2] sm:$0x3] %vm798_vm3, %v797_v6 }
 0x178   : > { %v807_v13 = vld [vmem:[#allocation2] sm:$0x3] }
 0x179   : > { %v808_v15 = vpack.c.bf16 %v807_v13, %v807_v13 }
 0x17b   : > { %1229 = vmatmul.mubr.msk.bf16.vlgmr.msra.gmra.mrb[0].mxu1 %vm500_vm2, %v808_v15 }
 0x218   : > { %v866_v18 = vpop.f32.mrb[0].mxu0 }
 0x219   : > { %v1222_v21 = vpop.f32.mrb[1].mxu0 }
 0x21a   : > { %v869_v24 = vpop.f32.mrb[2].mxu0 }
 0x21b   : > { %v1223_v26 = vpop.f32.mrb[3].mxu0 }
 0x24e   : > { %v921_v19 = vpop.f32.mrb[0].mxu1 }
 0x24f   : > { %v922_v22 = vadd.f32 %v921_v19, %v866_v18  ;;  %v1230_v23 = vpop.f32.mrb[1].mxu1 }
 0x250   : > { %v924_v25 = vpop.f32.mrb[2].mxu1 }
 0x251   : > { %v934_v27 = vadd.f32 %v1155_v20, %v922_v22  ;;  %v1231_v28 = vpop.f32.mrb[3].mxu1 }
 0x253   : > { %v935_v29 = vpack.c.bf16 %v934_v27, %v934_v27 }
 0x255   : > { %1237 = vmatmul.mubr.msk.bf16.vlgmr.msra.gmra.mrb[4].mxu0 %vm500_vm2, %v935_v29 }
 0x328   : > { %v996_v31 = vpop.f32.mrb[4].mxu0 }
 0x329   : > { %v997_v32 = vadd.f32 %v1156_v30, %v996_v31  ;;  %v1238_v33 = vpop.f32.mrb[5].mxu0 }
 0x32a   : > { %v999_v34 = vpop.f32.mrb[6].mxu0 }
 0x32b   : > { %1003 = vst.msk [vmem:[%s1717_s10] sm:$0x3] %vm1002_vm5, %v997_v32  ;;  %v1239_v35 = vpop.f32.mrb[7].mxu0 }
 0x32c PF: > { %s24_s17 = sadd.s32 1, %s1450_s17   ;;  %s1730_s15 = sld [smem:[#allocation12_spill]] }
 0x32d   : > { %p21_p11 = scmp.ge.s32.totalorder %s24_s17, 10   ;;  %s1731_s16 = smov %s1733_s23 }
 0x32f   :  { %23 = sbr.rel (!%p21_p11) target bundleno = 6 (0x6), region = 123 }
 0x336   :  { %1023 = vsyncpa [#allocation6], 1 }
 0x337   :  { %1025 = vsyncpa [#allocation6 + $0x1], 1 }
 0x338   :  { %1026 = vsyncpa [#allocation8], 1 }

</bundles_post_ra>
